<compile_context>
chip_gen: v7x
topology: tpu7x:2x2x1
jax: 0.10.0
libtpu: 0.0.40
codegen_flags: <defaults>
</compile_context>

<pallas_src>
import functools

import jax
import jax.numpy as jnp
from jax.experimental import pallas as pl
from jax.experimental.pallas import tpu as pltpu


PKEYS = ("wenc", "benc", "w1", "b1", "w2", "b2")


# --------------------------------------------------------------------------- #
# Kernel 1: encoder stub + MLP head + L2 normalize, streamed over C*HW chunks.
# --------------------------------------------------------------------------- #
def encode_kernel(x_ref, wpool_ref, benc_ref, w1_ref, b1_ref, w2_ref, b2_ref,
                  z_ref, acc_ref):
    f32, bf16 = jnp.float32, jnp.bfloat16
    kc = pl.program_id(1)

    @pl.when(kc == 0)
    def _():
        acc_ref[...] = jnp.zeros_like(acc_ref)

    # Backbone stub: GAP + linear projection folded into one bf16 MXU matmul
    # (pool weights pre-scaled by 1/HW wrapper-side), accumulated in f32 across
    # the streamed C*HW chunks.  Images arrive in their native dtype and are
    # cast to bf16 in-register (no wrapper-side HBM round trip, no f32 tile).
    acc_ref[...] += jnp.dot(x_ref[...].astype(bf16), wpool_ref[...],
                            preferred_element_type=f32)

    @pl.when(kc == pl.num_programs(1) - 1)
    def _():
        feat = acc_ref[...] + benc_ref[...]                       # (TB, dim_in)

        # MLP head: Linear -> ReLU -> Linear, bf16 operands, f32 accumulation.
        h = jnp.dot(feat.astype(bf16), w1_ref[...],
                    preferred_element_type=f32) + b1_ref[...]
        h = jnp.maximum(h, 0.0)
        z = jnp.dot(h.astype(bf16), w2_ref[...],
                    preferred_element_type=f32) + b2_ref[...]     # (TB, dim)

        # F.normalize(dim=1): z / max(||z||, 1e-12) == z * rsqrt(max(||z||^2,
        # 1e-24)); the divide is folded into a single EUP rsqrt-multiply.
        n2 = jnp.sum(z * z, axis=-1, keepdims=True)
        z_ref[...] = z * jax.lax.rsqrt(jnp.maximum(n2, 1e-24))


# --------------------------------------------------------------------------- #
# Kernel 2: row-tiled similarity + contrastive log-sum-exp loss -> scalar.
# --------------------------------------------------------------------------- #
def loss_kernel(q_ref, kfull_ref, kdiag_ref, out_ref, *, inv_T, inv_B):
    f32 = jnp.float32
    i = pl.program_id(0)
    q = q_ref[...]                                  # (TQ, dim), unit-norm

    # Positives: q_i . k_i on the matching key rows — O(TQ*dim) elementwise +
    # reduce instead of (B,B) iota masks + row reduction over sim.
    pos = jnp.sum(q * kdiag_ref[...], axis=-1, keepdims=True) * inv_T

    # Unit vectors => CosineSimilarity(dim=2, eps=1e-8) is exactly the dot
    # product; contract last axes directly (no transposed key copy) and fold
    # the 1/T scale into one multiply.
    sim = jax.lax.dot_general(q, kfull_ref[...], (((1,), (1,)), ((), ())),
                              preferred_element_type=f32) * inv_T   # (TQ, B)

    # loss_i = log(exp(pos_i) + sum_{j != i} exp(sim_ij)) - pos_i
    #        = logsumexp_j(sim_ij) - pos_i
    # (the torch.randperm shuffle of the negatives is sum-invariant -> drops).
    mx = jnp.max(sim, axis=-1, keepdims=True)
    lse = mx + jnp.log(jnp.sum(jnp.exp(sim - mx), axis=-1, keepdims=True))
    part = jnp.sum(lse - pos)

    # Scalar accumulated in the resident (1,1) output block across row tiles.
    @pl.when(i == 0)
    def _():
        out_ref[...] = jnp.zeros_like(out_ref)

    out_ref[...] += part

    @pl.when(i == pl.num_programs(0) - 1)
    def _():
        out_ref[...] *= inv_B


# --------------------------------------------------------------------------- #
# Generation-aware tiling / VMEM budget helpers.
# --------------------------------------------------------------------------- #
def _tpu_budget():
    """(vmem_limit_bytes with ~20% headroom, MXU-matched batch-tile target)."""
    try:
        vmem = int(pltpu.get_tpu_info().vmem_capacity_bytes)
    except Exception:
        vmem = 60 * 1024 * 1024          # conservative (v7x-sized) fallback
    try:
        kind = jax.devices()[0].device_kind.lower()
    except Exception:
        kind = ""
    old_gen = any(t in kind for t in ("v2", "v3", "v4", "v5"))
    tb_target = 128 if old_gen else 256  # 128-wide MXU on <=v5e, 256 on v6e/v7x
    return int(vmem * 0.8), tb_target


def _derive_tb(total, target):
    """Largest multiple-of-8 divisor of `total` that is <= target (else total)."""
    if total <= target:
        return total
    for t in range(target - target % 8, 7, -8):
        if total % t == 0:
            return t
    return total


def _derive_k_tile(total, cap, quantum=128):
    """Largest multiple-of-`quantum` divisor of `total` that is <= cap."""
    if total <= cap:
        return total
    t = (cap // quantum) * quantum
    while t >= quantum:
        if total % t == 0:
            return t
        t -= quantum
    return total


def _make_pool_weights(wenc, HW):
    """Fused GAP+projection weights: wpool[c*HW + j, :] = wenc[c, :] / HW."""
    return (jnp.repeat(wenc, HW, axis=0) * (1.0 / HW)).astype(jnp.bfloat16)


# --------------------------------------------------------------------------- #
# pallas_call wrappers
# --------------------------------------------------------------------------- #
def _encode_branch(x_flat, wpool, benc, w1, b1, w2, b2, *, TB, K_TILE,
                   vmem_limit):
    B, CHW = x_flat.shape
    dim_in, dim = w1.shape
    nb, nk = B // TB, CHW // K_TILE
    return pl.pallas_call(
        encode_kernel,
        out_shape=jax.ShapeDtypeStruct((B, dim), jnp.float32),
        grid=(nb, nk),
        in_specs=[
            pl.BlockSpec((TB, K_TILE), lambda b, k: (b, k)),       # image chunk
            pl.BlockSpec((K_TILE, dim_in), lambda b, k: (k, 0)),   # pool weights
            pl.BlockSpec((1, dim_in), lambda b, k: (0, 0)),        # benc
            pl.BlockSpec((dim_in, dim), lambda b, k: (0, 0)),      # w1
            pl.BlockSpec((1, dim), lambda b, k: (0, 0)),           # b1
            pl.BlockSpec((dim, dim), lambda b, k: (0, 0)),         # w2
            pl.BlockSpec((1, dim), lambda b, k: (0, 0)),           # b2
        ],
        out_specs=pl.BlockSpec((TB, dim), lambda b, k: (b, 0)),
        scratch_shapes=[pltpu.VMEM((TB, dim_in), jnp.float32)],
        compiler_params=pltpu.CompilerParams(
            # Batch tiles are independent ("parallel", feeds megacore parts);
            # the C*HW streaming axis carries the accumulator ("arbitrary").
            dimension_semantics=("parallel", "arbitrary"),
            vmem_limit_bytes=vmem_limit,
        ),
    )(x_flat, wpool, benc, w1, b1, w2, b2)


def _contrastive_loss(zq, zk, *, TQ, inv_T, vmem_limit):
    B, dim = zq.shape
    loss = pl.pallas_call(
        functools.partial(loss_kernel, inv_T=inv_T, inv_B=1.0 / B),
        out_shape=jax.ShapeDtypeStruct((1, 1), jnp.float32),
        grid=(B // TQ,),
        in_specs=[
            pl.BlockSpec((TQ, dim), lambda i: (i, 0)),   # query row tile
            pl.BlockSpec((B, dim), lambda i: (0, 0)),    # all keys (resident)
            pl.BlockSpec((TQ, dim), lambda i: (i, 0)),   # matching key rows
        ],
        out_specs=pl.BlockSpec((1, 1), lambda i: (0, 0)),
        compiler_params=pltpu.CompilerParams(
            dimension_semantics=("arbitrary",),
            vmem_limit_bytes=vmem_limit,
        ),
    )(zq, zk, zk)
    return loss[0, 0]


# --------------------------------------------------------------------------- #
# Forward
# --------------------------------------------------------------------------- #
@functools.partial(jax.jit, static_argnames=("T", "m", "TB", "K_TILE", "TQ"))
def simo_forward(im_q, im_k, params, T=0.1, m=0.999, TB=None, K_TILE=None,
                 TQ=None):
    B, C, H, W = im_q.shape
    HW = H * W
    CHW = C * HW
    dim_in, dim = params["w1"].shape
    f32, bf16 = jnp.float32, jnp.bfloat16

    vmem_limit, tb_target = _tpu_budget()
    if TB is None:
        TB = _derive_tb(B, tb_target)
    if K_TILE is None:
        # Two pipeline buffers of the streamed image tile (native f32) use at
        # most ~half the VMEM budget; the rest holds resident weights + output.
        k_cap = max(128, (vmem_limit // 2) // (2 * TB * 4))
        K_TILE = _derive_k_tile(CHW, k_cap)
    if TQ is None:
        TQ = _derive_tb(B, 256)
    assert B % TB == 0 and (TB == B or TB % 8 == 0)
    assert CHW % K_TILE == 0 and (K_TILE == CHW or K_TILE % 128 == 0)
    assert B % TQ == 0 and (TQ == B or TQ % 8 == 0)

    # Momentum update of the key encoder/head (parameter-state update, plain
    # JAX; tiny).  The forward uses the *updated* key params, as in PyTorch.
    # TODO(synk): real MoCo training must persist pk; forward-only here.
    pk = {k_: m * params[k_ + "_k"] + (1.0 - m) * params[k_] for k_ in PKEYS}
    pq = {k_: params[k_] for k_ in PKEYS}

    # Images: flat (B, C*HW) view, native dtype (no stack / pre-cast copies —
    # the kernel is HBM-bound on these reads).
    x_q = im_q.reshape(B, CHW)
    x_k = im_k.reshape(B, CHW)

    def branch_args(p):
        return (_make_pool_weights(p["wenc"], HW),
                p["benc"].astype(f32),
                p["w1"].astype(bf16), p["b1"].astype(f32),
                p["w2"].astype(bf16), p["b2"].astype(f32))

    z_q = _encode_branch(x_q, *branch_args(pq), TB=TB, K_TILE=K_TILE,
                         vmem_limit=vmem_limit)
    z_k = _encode_branch(x_k, *branch_args(pk), TB=TB, K_TILE=K_TILE,
                         vmem_limit=vmem_limit)

    return _contrastive_loss(z_q, z_k, TQ=TQ, inv_T=1.0 / T,
                             vmem_limit=vmem_limit)


# --------------------------------------------------------------------------- #
# Params / reference
# --------------------------------------------------------------------------- #
def init_params(key, C, dim_in, dim):
    ks = jax.random.split(key, 10)

    def branch(kw, k1, kb1, k2, kb2):
        return dict(
            wenc=jax.random.normal(kw, (C, dim_in), jnp.float32) * 0.1,
            benc=jnp.zeros((1, dim_in), jnp.float32),
            w1=jax.random.normal(k1, (dim_in, dim), jnp.float32) / jnp.sqrt(dim_in),
            b1=jax.random.normal(kb1, (1, dim), jnp.float32) * 0.01,
            w2=jax.random.normal(k2, (dim, dim), jnp.float32) / jnp.sqrt(dim),
            b2=jax.random.normal(kb2, (1, dim), jnp.float32) * 0.01,
        )

    pq = branch(*ks[:5])
    pkey = branch(*ks[5:])          # distinct key params to exercise plumbing
    params = dict(pq)
    params.update({k + "_k": v for k, v in pkey.items()})
    return params


def simo_reference(im_q, im_k, params, T=0.1, m=0.999):
    """Pure-JAX reference with the same bf16-matmul / f32-accumulate policy."""
    B, C, H, W = im_q.shape
    HW = H * W
    bf16, f32 = jnp.bfloat16, jnp.float32
    pk = {k_: m * params[k_ + "_k"] + (1.0 - m) * params[k_] for k_ in PKEYS}
    pq = {k_: params[k_] for k_ in PKEYS}

    def enc_head(im, p):
        x = im.reshape(B, C * HW)
        wpool = _make_pool_weights(p["wenc"], HW)
        feat = jnp.dot(x.astype(bf16), wpool,
                       preferred_element_type=f32) + p["benc"]
        h = jnp.maximum(
            jnp.dot(feat.astype(bf16), p["w1"].astype(bf16),
                    preferred_element_type=f32) + p["b1"], 0.0)
        z = jnp.dot(h.astype(bf16), p["w2"].astype(bf16),
                    preferred_element_type=f32) + p["b2"]
        n = jnp.linalg.norm(z, axis=-1, keepdims=True)
        return z / jnp.maximum(n, 1e-12)

    qn = enc_head(im_q, pq)
    kn = enc_head(im_k, pk)
    sim = (qn @ kn.T) / T                            # unit-norm -> cosine == dot
    pos = jnp.diag(sim)[:, None]
    mx = jnp.max(sim, axis=-1, keepdims=True)
    lse = mx + jnp.log(jnp.sum(jnp.exp(sim - mx), axis=-1, keepdims=True))
    return jnp.mean(lse - pos)


if __name__ == "__main__":
    key = jax.random.PRNGKey(0)
    k_q, k_k, k_p = jax.random.split(key, 3)

    B, C, H, W = 16, 4, 16, 16        # small analogue of bsz=256, 3x224x224
    dim_in, dim = 256, 128            # analogues of 2048 (resnet50) and 128
    T, mom = 0.1, 0.999

    im_q = jax.random.normal(k_q, (B, C, H, W), jnp.float32)
    im_k = jax.random.normal(k_k, (B, C, H, W), jnp.float32)
    params = init_params(k_p, C, dim_in, dim)

    # Small explicit tile overrides so the toy shapes still exercise the
    # multi-tile batch / K-streaming / row-tiled-loss grid paths; production
    # calls leave them None and get MXU-sized tiles derived per generation.
    loss = simo_forward(im_q, im_k, params, T=T, m=mom, TB=8, K_TILE=512, TQ=8)
    loss = jax.block_until_ready(loss)

    ref = simo_reference(im_q, im_k, params, T=T, m=mom)
    err = abs(float(loss) - float(ref))
    assert err < 5e-3, (float(loss), float(ref), err)

    print("KERNEL_OK")
</pallas_src>

<mosaic_0001>
module attributes {stable_mosaic.version = 11 : i64} {
  func.func @encode_kernel(%arg0: i32, %arg1: i32, %arg2: memref<8x512xf32, #tpu.memory_space<vmem>>, %arg3: memref<512x256xbf16, #tpu.memory_space<vmem>>, %arg4: memref<1x256xf32, #tpu.memory_space<vmem>>, %arg5: memref<256x128xbf16, #tpu.memory_space<vmem>>, %arg6: memref<1x128xf32, #tpu.memory_space<vmem>>, %arg7: memref<128x128xbf16, #tpu.memory_space<vmem>>, %arg8: memref<1x128xf32, #tpu.memory_space<vmem>>, %arg9: memref<8x128xf32, #tpu.memory_space<vmem>>, %arg10: memref<8x256xf32, #tpu.memory_space<vmem>>) attributes {dimension_semantics = [#tpu.dimension_semantics<parallel>, #tpu.dimension_semantics<arbitrary>], iteration_bounds = array<i64: 2, 2>, scalar_prefetch = 0 : i64, scratch_operands = 1 : i64, tpu.core_type = #tpu.core_type<tc>, window_params = [{transform_indices = @transform_0, window_bounds = array<i64: 8, 512>}, {transform_indices = @transform_1, window_bounds = array<i64: 512, 256>}, {pipeline_mode = #tpu.pipeline_mode<synchronous>, transform_indices = @transform_2, window_bounds = array<i64: 1, 256>}, {pipeline_mode = #tpu.pipeline_mode<synchronous>, transform_indices = @transform_3, window_bounds = array<i64: 256, 128>}, {pipeline_mode = #tpu.pipeline_mode<synchronous>, transform_indices = @transform_4, window_bounds = array<i64: 1, 128>}, {pipeline_mode = #tpu.pipeline_mode<synchronous>, transform_indices = @transform_5, window_bounds = array<i64: 128, 128>}, {pipeline_mode = #tpu.pipeline_mode<synchronous>, transform_indices = @transform_6, window_bounds = array<i64: 1, 128>}, {transform_indices = @transform_7, window_bounds = array<i64: 8, 128>}]} {
    %c0_i32 = arith.constant 0 : i32
    %0 = arith.cmpi eq, %arg1, %c0_i32 : i32
    %1 = arith.extui %0 : i1 to i32
    %c0_i32_0 = arith.constant 0 : i32
    %2 = arith.cmpi ne, %1, %c0_i32_0 : i32
    scf.if %2 {
      %cst_9 = arith.constant 0.000000e+00 : f32
      %13 = vector.broadcast %cst_9 : f32 to vector<8x256xf32>
      %c0_10 = arith.constant 0 : index
      %c0_11 = arith.constant 0 : index
      %14 = vector.load %arg10[%c0_10, %c0_11] : memref<8x256xf32, #tpu.memory_space<vmem>>, vector<8x256xf32>
      tpu.vector_store %arg10[%c0_10, %c0_11], %13 {strides = array<i32>} : memref<8x256xf32, #tpu.memory_space<vmem>>, vector<8x256xf32>,
    } else {
    }
    %c0 = arith.constant 0 : index
    %c0_1 = arith.constant 0 : index
    %3 = vector.load %arg10[%c0, %c0_1] : memref<8x256xf32, #tpu.memory_space<vmem>>, vector<8x256xf32>
    %c0_2 = arith.constant 0 : index
    %c0_3 = arith.constant 0 : index
    %4 = vector.load %arg2[%c0_2, %c0_3] : memref<8x512xf32, #tpu.memory_space<vmem>>, vector<8x512xf32>
    %5 = arith.truncf %4 : vector<8x512xf32> to vector<8x512xbf16>
    %c0_4 = arith.constant 0 : index
    %c0_5 = arith.constant 0 : index
    %6 = vector.load %arg3[%c0_4, %c0_5] : memref<512x256xbf16, #tpu.memory_space<vmem>>, vector<512x256xbf16>
    %cst = arith.constant dense<0.000000e+00> : vector<8x256xf32>
    %7 = tpu.matmul %5, %6, %cst {dimension_numbers = #tpu.dot_dimension_numbers<[1], [0], [0], [1], [0, 0, 1, 1], [], []>} : vector<8x512xbf16>, vector<512x256xbf16>, vector<8x256xf32> -> vector<8x256xf32>
    %8 = arith.addf %3, %7 : vector<8x256xf32>
    %c0_6 = arith.constant 0 : index
    %c0_7 = arith.constant 0 : index
    %9 = vector.load %arg10[%c0_6, %c0_7] : memref<8x256xf32, #tpu.memory_space<vmem>>, vector<8x256xf32>
    tpu.vector_store %arg10[%c0_6, %c0_7], %8 {strides = array<i32>} : memref<8x256xf32, #tpu.memory_space<vmem>>, vector<8x256xf32>,
    %c1_i32 = arith.constant 1 : i32
    %10 = arith.cmpi eq, %arg1, %c1_i32 : i32
    %11 = arith.extui %10 : i1 to i32
    %c0_i32_8 = arith.constant 0 : i32
    %12 = arith.cmpi ne, %11, %c0_i32_8 : i32
    scf.if %12 {
      %c0_9 = arith.constant 0 : index
      %c0_10 = arith.constant 0 : index
      %13 = vector.load %arg10[%c0_9, %c0_10] : memref<8x256xf32, #tpu.memory_space<vmem>>, vector<8x256xf32>
      %c0_11 = arith.constant 0 : index
      %c0_12 = arith.constant 0 : index
      %14 = vector.load %arg4[%c0_11, %c0_12] : memref<1x256xf32, #tpu.memory_space<vmem>>, vector<1x256xf32>
      %15 = vector.broadcast %14 : vector<1x256xf32> to vector<8x256xf32>
      %16 = arith.addf %13, %15 : vector<8x256xf32>
      %17 = arith.truncf %16 : vector<8x256xf32> to vector<8x256xbf16>
      %c0_13 = arith.constant 0 : index
      %c0_14 = arith.constant 0 : index
      %18 = vector.load %arg5[%c0_13, %c0_14] : memref<256x128xbf16, #tpu.memory_space<vmem>>, vector<256x128xbf16>
      %cst_15 = arith.constant dense<0.000000e+00> : vector<8x128xf32>
      %19 = tpu.matmul %17, %18, %cst_15 {dimension_numbers = #tpu.dot_dimension_numbers<[1], [0], [0], [1], [0, 0, 1, 1], [], []>} : vector<8x256xbf16>, vector<256x128xbf16>, vector<8x128xf32> -> vector<8x128xf32>
      %c0_16 = arith.constant 0 : index
      %c0_17 = arith.constant 0 : index
      %20 = vector.load %arg6[%c0_16, %c0_17] : memref<1x128xf32, #tpu.memory_space<vmem>>, vector<1x128xf32>
      %21 = vector.broadcast %20 : vector<1x128xf32> to vector<8x128xf32>
      %22 = arith.addf %19, %21 : vector<8x128xf32>
      %cst_18 = arith.constant 0.000000e+00 : f32
      %23 = vector.broadcast %cst_18 : f32 to vector<8x128xf32>
      %24 = arith.maximumf %22, %23 : vector<8x128xf32>
      %25 = arith.truncf %24 : vector<8x128xf32> to vector<8x128xbf16>
      %c0_19 = arith.constant 0 : index
      %c0_20 = arith.constant 0 : index
      %26 = vector.load %arg7[%c0_19, %c0_20] : memref<128x128xbf16, #tpu.memory_space<vmem>>, vector<128x128xbf16>
      %cst_21 = arith.constant dense<0.000000e+00> : vector<8x128xf32>
      %27 = tpu.matmul %25, %26, %cst_21 {dimension_numbers = #tpu.dot_dimension_numbers<[1], [0], [0], [1], [0, 0, 1, 1], [], []>} : vector<8x128xbf16>, vector<128x128xbf16>, vector<8x128xf32> -> vector<8x128xf32>
      %c0_22 = arith.constant 0 : index
      %c0_23 = arith.constant 0 : index
      %28 = vector.load %arg8[%c0_22, %c0_23] : memref<1x128xf32, #tpu.memory_space<vmem>>, vector<1x128xf32>
      %29 = vector.broadcast %28 : vector<1x128xf32> to vector<8x128xf32>
      %30 = arith.addf %27, %29 : vector<8x128xf32>
      %31 = arith.mulf %30, %30 : vector<8x128xf32>
      %cst_24 = arith.constant dense<0.000000e+00> : vector<8xf32>
      %32 = vector.multi_reduction <add>, %31, %cst_24 [1] : vector<8x128xf32> to vector<8xf32>
      %33 = vector.shape_cast %32 : vector<8xf32> to vector<8x1xf32>
      %cst_25 = arith.constant 1.000000e-24 : f32
      %34 = vector.broadcast %cst_25 : f32 to vector<8x1xf32>
      %35 = arith.maximumf %33, %34 : vector<8x1xf32>
      %36 = math.rsqrt %35 : vector<8x1xf32>
      %37 = vector.broadcast %36 : vector<8x1xf32> to vector<8x128xf32>
      %38 = arith.mulf %30, %37 : vector<8x128xf32>
      %c0_26 = arith.constant 0 : index
      %c0_27 = arith.constant 0 : index
      %39 = vector.load %arg9[%c0_26, %c0_27] : memref<8x128xf32, #tpu.memory_space<vmem>>, vector<8x128xf32>
      tpu.vector_store %arg9[%c0_26, %c0_27], %38 {strides = array<i32>} : memref<8x128xf32, #tpu.memory_space<vmem>>, vector<8x128xf32>,
    } else {
    }
    return
  }
  func.func @transform_0(%arg0: i32, %arg1: i32) -> (i32, i32) {
    %c0_i32 = arith.constant 0 : i32
    return %arg0, %arg1 : i32, i32
  }
  func.func @transform_1(%arg0: i32, %arg1: i32) -> (i32, i32) {
    %c0_i32 = arith.constant 0 : i32
    %c0_i32_0 = arith.constant 0 : i32
    return %arg1, %c0_i32 : i32, i32
  }
  func.func @transform_2(%arg0: i32, %arg1: i32) -> (i32, i32) {
    %c0_i32 = arith.constant 0 : i32
    %c0_i32_0 = arith.constant 0 : i32
    %c0_i32_1 = arith.constant 0 : i32
    return %c0_i32, %c0_i32_0 : i32, i32
  }
  func.func @transform_3(%arg0: i32, %arg1: i32) -> (i32, i32) {
    %c0_i32 = arith.constant 0 : i32
    %c0_i32_0 = arith.constant 0 : i32
    %c0_i32_1 = arith.constant 0 : i32
    return %c0_i32, %c0_i32_0 : i32, i32
  }
  func.func @transform_4(%arg0: i32, %arg1: i32) -> (i32, i32) {
    %c0_i32 = arith.constant 0 : i32
    %c0_i32_0 = arith.constant 0 : i32
    %c0_i32_1 = arith.constant 0 : i32
    return %c0_i32, %c0_i32_0 : i32, i32
  }
  func.func @transform_5(%arg0: i32, %arg1: i32) -> (i32, i32) {
    %c0_i32 = arith.constant 0 : i32
    %c0_i32_0 = arith.constant 0 : i32
    %c0_i32_1 = arith.constant 0 : i32
    return %c0_i32, %c0_i32_0 : i32, i32
  }
  func.func @transform_6(%arg0: i32, %arg1: i32) -> (i32, i32) {
    %c0_i32 = arith.constant 0 : i32
    %c0_i32_0 = arith.constant 0 : i32
    %c0_i32_1 = arith.constant 0 : i32
    return %c0_i32, %c0_i32_0 : i32, i32
  }
  func.func @transform_7(%arg0: i32, %arg1: i32) -> (i32, i32) {
    %c0_i32 = arith.constant 0 : i32
    %c0_i32_0 = arith.constant 0 : i32
    return %arg0, %c0_i32 : i32, i32
  }
}

module attributes {stable_mosaic.version = 11 : i64} {
  func.func @loss_kernel(%arg0: i32, %arg1: memref<8x128xf32, #tpu.memory_space<vmem>>, %arg2: memref<16x128xf32, #tpu.memory_space<vmem>>, %arg3: memref<8x128xf32, #tpu.memory_space<vmem>>, %arg4: memref<1x1xf32, #tpu.memory_space<vmem>>) attributes {dimension_semantics = [#tpu.dimension_semantics<arbitrary>], iteration_bounds = array<i64: 2>, scalar_prefetch = 0 : i64, scratch_operands = 0 : i64, tpu.core_type = #tpu.core_type<tc>, window_params = [{transform_indices = @transform_0, window_bounds = array<i64: 8, 128>}, {pipeline_mode = #tpu.pipeline_mode<synchronous>, transform_indices = @transform_1, window_bounds = array<i64: 16, 128>}, {transform_indices = @transform_2, window_bounds = array<i64: 8, 128>}, {pipeline_mode = #tpu.pipeline_mode<synchronous>, transform_indices = @transform_3, window_bounds = array<i64: 1, 1>}]} {
    %c0 = arith.constant 0 : index
    %c0_0 = arith.constant 0 : index
    %0 = vector.load %arg1[%c0, %c0_0] : memref<8x128xf32, #tpu.memory_space<vmem>>, vector<8x128xf32>
    %c0_1 = arith.constant 0 : index
    %c0_2 = arith.constant 0 : index
    %1 = vector.load %arg3[%c0_1, %c0_2] : memref<8x128xf32, #tpu.memory_space<vmem>>, vector<8x128xf32>
    %2 = arith.mulf %0, %1 : vector<8x128xf32>
    %cst = arith.constant dense<0.000000e+00> : vector<8xf32>
    %3 = vector.multi_reduction <add>, %2, %cst [1] : vector<8x128xf32> to vector<8xf32>
    %4 = vector.shape_cast %3 : vector<8xf32> to vector<8x1xf32>
    %cst_3 = arith.constant 1.000000e+01 : f32
    %5 = vector.broadcast %cst_3 : f32 to vector<8x1xf32>
    %6 = arith.mulf %4, %5 : vector<8x1xf32>
    %c0_4 = arith.constant 0 : index
    %c0_5 = arith.constant 0 : index
    %7 = vector.load %arg2[%c0_4, %c0_5] : memref<16x128xf32, #tpu.memory_space<vmem>>, vector<16x128xf32>
    %cst_6 = arith.constant dense<0.000000e+00> : vector<8x16xf32>
    %8 = tpu.matmul %0, %7, %cst_6 {dimension_numbers = #tpu.dot_dimension_numbers<[1], [1], [0], [0], [0, 0, 1, 0], [], []>} : vector<8x128xf32>, vector<16x128xf32>, vector<8x16xf32> -> vector<8x16xf32>
    %cst_7 = arith.constant 1.000000e+01 : f32
    %9 = vector.broadcast %cst_7 : f32 to vector<8x16xf32>
    %10 = arith.mulf %8, %9 : vector<8x16xf32>
    %cst_8 = arith.constant dense<0xFF800000> : vector<8xf32>
    %11 = vector.multi_reduction <maximumf>, %10, %cst_8 [1] : vector<8x16xf32> to vector<8xf32>
    %12 = vector.shape_cast %11 : vector<8xf32> to vector<8x1xf32>
    %13 = vector.broadcast %12 : vector<8x1xf32> to vector<8x16xf32>
    %14 = arith.subf %10, %13 : vector<8x16xf32>
    %15 = math.exp %14 : vector<8x16xf32>
    %cst_9 = arith.constant dense<0.000000e+00> : vector<8xf32>
    %16 = vector.multi_reduction <add>, %15, %cst_9 [1] : vector<8x16xf32> to vector<8xf32>
    %17 = vector.shape_cast %16 : vector<8xf32> to vector<8x1xf32>
    %18 = math.log %17 : vector<8x1xf32>
    %19 = arith.addf %12, %18 : vector<8x1xf32>
    %20 = arith.subf %19, %6 : vector<8x1xf32>
    %21 = vector.shape_cast %20 : vector<8x1xf32> to vector<1x8x1xf32>
    %cst_10 = arith.constant dense<0.000000e+00> : vector<1xf32>
    %22 = vector.multi_reduction <add>, %21, %cst_10 [1, 2] : vector<1x8x1xf32> to vector<1xf32>
    %23 = vector.shape_cast %22 : vector<1xf32> to vector<1x1x1xf32>
    %24 = vector.extract %23[0, 0, 0] : f32 from vector<1x1x1xf32>
    %c0_i32 = arith.constant 0 : i32
    %25 = arith.cmpi eq, %arg0, %c0_i32 : i32
    %26 = arith.extui %25 : i1 to i32
    %c0_i32_11 = arith.constant 0 : i32
    %27 = arith.cmpi ne, %26, %c0_i32_11 : i32
    scf.if %27 {
      %cst_17 = arith.constant 0.000000e+00 : f32
      %35 = vector.broadcast %cst_17 : f32 to vector<1x1xf32>
      %c0_18 = arith.constant 0 : index
      %c0_19 = arith.constant 0 : index
      %36 = vector.load %arg4[%c0_18, %c0_19] : memref<1x1xf32, #tpu.memory_space<vmem>>, vector<1x1xf32>
      tpu.vector_store %arg4[%c0_18, %c0_19], %35 {strides = array<i32>} : memref<1x1xf32, #tpu.memory_space<vmem>>, vector<1x1xf32>,
    } else {
    }
    %c0_12 = arith.constant 0 : index
    %c0_13 = arith.constant 0 : index
    %28 = vector.load %arg4[%c0_12, %c0_13] : memref<1x1xf32, #tpu.memory_space<vmem>>, vector<1x1xf32>
    %29 = vector.broadcast %24 : f32 to vector<1x1xf32>
    %30 = arith.addf %28, %29 : vector<1x1xf32>
    %c0_14 = arith.constant 0 : index
    %c0_15 = arith.constant 0 : index
    %31 = vector.load %arg4[%c0_14, %c0_15] : memref<1x1xf32, #tpu.memory_space<vmem>>, vector<1x1xf32>
    tpu.vector_store %arg4[%c0_14, %c0_15], %30 {strides = array<i32>} : memref<1x1xf32, #tpu.memory_space<vmem>>, vector<1x1xf32>,
    %c1_i32 = arith.constant 1 : i32
    %32 = arith.cmpi eq, %arg0, %c1_i32 : i32
    %33 = arith.extui %32 : i1 to i32
    %c0_i32_16 = arith.constant 0 : i32
    %34 = arith.cmpi ne, %33, %c0_i32_16 : i32
    scf.if %34 {
      %c0_17 = arith.constant 0 : index
      %c0_18 = arith.constant 0 : index
      %35 = vector.load %arg4[%c0_17, %c0_18] : memref<1x1xf32, #tpu.memory_space<vmem>>, vector<1x1xf32>
      %cst_19 = arith.constant 6.250000e-02 : f32
      %36 = vector.broadcast %cst_19 : f32 to vector<1x1xf32>
      %37 = arith.mulf %35, %36 : vector<1x1xf32>
      %c0_20 = arith.constant 0 : index
      %c0_21 = arith.constant 0 : index
      %38 = vector.load %arg4[%c0_20, %c0_21] : memref<1x1xf32, #tpu.memory_space<vmem>>, vector<1x1xf32>
      tpu.vector_store %arg4[%c0_20, %c0_21], %37 {strides = array<i32>} : memref<1x1xf32, #tpu.memory_space<vmem>>, vector<1x1xf32>,
    } else {
    }
    return
  }
  func.func @transform_0(%arg0: i32) -> (i32, i32) {
    %c0_i32 = arith.constant 0 : i32
    %c0_i32_0 = arith.constant 0 : i32
    return %arg0, %c0_i32 : i32, i32
  }
  func.func @transform_1(%arg0: i32) -> (i32, i32) {
    %c0_i32 = arith.constant 0 : i32
    %c0_i32_0 = arith.constant 0 : i32
    %c0_i32_1 = arith.constant 0 : i32
    return %c0_i32, %c0_i32_0 : i32, i32
  }
  func.func @transform_2(%arg0: i32) -> (i32, i32) {
    %c0_i32 = arith.constant 0 : i32
    %c0_i32_0 = arith.constant 0 : i32
    return %arg0, %c0_i32 : i32, i32
  }
  func.func @transform_3(%arg0: i32) -> (i32, i32) {
    %c0_i32 = arith.constant 0 : i32
    %c0_i32_0 = arith.constant 0 : i32
    %c0_i32_1 = arith.constant 0 : i32
    return %c0_i32, %c0_i32_0 : i32, i32
  }
}

</mosaic_0001>

<bundles_post_ra>
// kernel: simo_forward.5
= control target key start
LH: loop header
LB: loop body
LE: loop exit
PB: predicated region body
PF: predicated region fallthrough
CT: control target
= control target key end

     0   :  { %8 = vsyncpa [#allocation3], 0  ;;  %s464_s12 = smov 0   ;;  %s516_s0 = inlined_call_operand.vmem [shape: f32[16,128], index: 0, kind: input, shape index: {}]   ;;  %s517_s1 = inlined_call_operand.vmem [shape: f32[16,128], index: 1, kind: input, shape index: {}, may-alias: {1,2}]   ;;  %s518_s2 = inlined_call_operand.vmem [shape: f32[16,128], index: 2, kind: input, shape index: {}, may-alias: {1,2}]   ;;  %s519_s3 = inlined_call_operand.hbm [shape: f32[1,1], index: 3, kind: output, shape index: {}]  }
   0x1 LB: > { %s470_s13 = sadd.s32 4294967295, %s437_s12   ;;  %p354_p0 = scmp.ge.s32.totalorder %s437_s12, 1  ;;  %s437_s12 = sphi %s464_s12, %s14_s12  }
   0x2   : > { %p141_p1 = scmp.lt.s32.totalorder %s437_s12, 3 }
   0x4   : > { %p142_p2 = pnand %p354_p0, %p141_p1 }
   0x5   : > { %v177_v0 = vld [vmem:[%s517_s1] sm:$0xff] (!%p142_p2)  ;;  %v178_v1 = vld [vmem:[%s517_s1 + $0x8] sm:$0xff] (!%p142_p2)  ;;  %p163_p3 = scmp.lt.s32.totalorder (!%p142_p2), %s470_s13, 1  ;;  %v439_v2 = vmov (!%p142_p2), 0.0|0.0   ;;  %vm440_vm0 = vmmov (!%p142_p2), 0   ;;  %v441_v4 = vmov (!%p142_p2), 0.0  }
   0x6   : > { %145 = sbr.rel (%p142_p2) target bundleno = 794 (0x31a), region = 32  ;;  %373 = vmatprep.subr.bf16.mxu0 (!%p142_p2), %v439_v2  ;;  %v374_v3 = vpack.c.bf16 (!%p142_p2), %v178_v1, %v177_v0  ;;  %370 = vmatprep.mubr.msk.f32.mxu0 (!%p142_p2), %vm440_vm0, %v441_v4  ;;  %vm250_vm1 = vcmask (!%p142_p2), 130048   ;;  %vm264_vm2 = vcmask (!%p142_p2), 7168   ;;  %p357_p4 = scmp.ne.s32.totalorder (!%p142_p2), %s470_s13, 0 }
   0x8   : > { %375 = vmatpush3.bf16.xpose.msra.mxu0 (!%p142_p2), %v374_v3 }
   0xd   : > { %s164_s18 = scalar_select %p163_p3, %s470_s13, 1 }
   0xe   : > { %vm279_vm3 = vcmask (!%p357_p4), 0   ;;  %v442_v32 = vmov (!%p357_p4), 0.0  }
   0xf   : > { %s355_s19 = sshll.u32 %s164_s18, 3  ;;  %280 = vst.msk [vmem:[#allocation2] sm:$0x1] (!%p357_p4), %vm279_vm3, %v442_v32 }
  0x10   : > { %s166_s22 = scalar_lea.vmem %s516_s0, %s355_s19  ;;  %s170_s25 = scalar_lea.vmem %s518_s2, %s355_s19 }
  0x11   : > { %v171_v5 = vld [vmem:[%s166_s22] sm:$0xff] }
  0x12   : > { %371 = vmatmul.mubr.f32.vlgmr.msra.gmra.mrb[0].mxu0 %v171_v5  ;;  %v172_v10 = vld [vmem:[%s170_s25] sm:$0xff] }
  0x13   : > { %v173_v11 = vmul.f32 %v172_v10, %v171_v5 }
  0x15   : > { %174 = vadd.xlane.f32.xlu1 %v173_v11 }
  0xa2   : > { %v175_v18 = vpop.xlane.xlu1 %174 }
  0xa3   : > { %v176_v21 = vmul.f32 10.0, %v175_v18 }
  0xe5   : > { %v245_v6 = vpop.f32.mrb[0].mxu0 }
  0xe6   : > { %v249_v7 = vmul.f32 10.0, %v245_v6  ;;  %v372_v8 = vpop.f32.mrb[1].mxu0 }
  0xe8   : > { %v251_v9 = vsel %vm250_vm1, %v249_v7, -inf }
  0xe9   : > { %252 = vmax.xlane.f32.xlu0 %v251_v9 }
 0x176   : > { %v253_v12 = vpop.xlane.xlu0 %252 }
 0x177   : > { %v254_v13 = vsub.f32 %v249_v7, %v253_v12 }
 0x179   : > { %v255_v14 = vmul.f32 1.442695, %v254_v13 }
 0x17b   : > { %397 = vpow2.f32 %v255_v14 }
 0x185   : > { %v398_v15 = vpop.eup %397 }
 0x186   : > { %v257_v16 = vsel %vm250_vm1, %v398_v15, 0.0 }
 0x187   : > { %258 = vadd.xlane.f32.xlu0 %v257_v16 }
 0x214   : > { %v259_v17 = vpop.xlane.xlu0 %258 }
 0x215   : > { %399 = vlog2.f32 %v259_v17 }
 0x21f   : > { %v400_v19 = vpop.eup %399 }
 0x220   : > { %v261_v20 = vmul.f32 0.6931472, %v400_v19 }
 0x222   : > { %v262_v22 = vadd.f32 %v261_v20, %v253_v12 }
 0x224   : > { %v263_v23 = vsub.f32 %v262_v22, %v176_v21 }
 0x226   : > { %v265_v24 = vsel %vm264_vm2, %v263_v23, 0.0 }
 0x227   : > { %266 = vadd.xlane.f32.xlu1 %v265_v24 }
 0x2b4   : > { %v267_v25 = vpop.xlane.xlu1 %266 }
 0x2b5   : > { %v268_v26 = vrot.slane %v267_v25, 4 }
 0x2b7   : > { %v269_v27 = vadd.f32 %v268_v26, %v267_v25 }
 0x2b9   : > { %v270_v28 = vrot.slane %v269_v27, 2 }
 0x2bb   : > { %v271_v29 = vadd.f32 %v270_v28, %v269_v27 }
 0x2bd   : > { %v272_v30 = vrot.slane %v271_v29, 1 }
 0x2bf   : > { %v273_v31 = vadd.f32 %v272_v30, %v271_v29 }
 0x2c1   : > { %376 = vpush %v273_v31 }
 0x2ec   : > { %278 = sbr.rel (%p357_p4) target bundleno = 755 (0x2f3), region = 36 }
 0x2f2   : > { %s377_s26 = spop %376 }
 0x2f3 PF: > { %v281_v33 = vld [vmem:[#allocation2] sm:$0x1]  ;;  %v282_v34 = vstv %s377_s26  ;;  %vm284_vm4 = vcmask 0   ;;  %p358_p5 = scmp.ne.s32.totalorder %s470_s13, 1 }
 0x2f4   : > { %v283_v35 = vadd.f32 %v282_v34, %v281_v33 }
 0x2f5   : > { %289 = sbr.rel (%p358_p5) target bundleno = 769 (0x301), region = 40 }
 0x2f6   : > { %285 = vst.msk [vmem:[#allocation2] sm:$0x1] %vm284_vm4, %v283_v35 }
 0x2fd   : > { %v290_v36 = vld [vmem:[#allocation2] sm:$0x1] }
 0x2fe   : > { %v291_v37 = vmul.f32 0.0625, %v290_v36 }
 0x300   : > { %292 = vst.msk [vmem:[#allocation2] sm:$0x1] %vm284_vm4, %v291_v37 }
 0x301 PF: > { %p382_p6 = scmp.eq.s32.totalorder %s470_s13, 1  ;;  %s443_s27 = smov [#allocation2]  }
 0x302   : > { %s300_s28 = sshll.u32 %s443_s27, 4  ;;  %s301_s28 = int_to_ptr.vmem [resolvable:$true] %s300_s28 }
 0x303   : > { %s401_s29 = scalar_lea.vmem %s301_s28, 16  ;;  %s407_s30 = scalar_lea.vmem %s301_s28, 32 }
 0x304   : > { %p402_p7 = scmp.ne.s32.totalorder %s301_s28, %s401_s29  ;;  %p408_p10 = scmp.lt.s32.totalorder %s301_s28, %s301_s28 }
 0x305   : > { %p409_p11 = scmp.lt.s32.totalorder %s407_s30, %s401_s29 }
 0x306   : > { %p403_p8 = pnand %p402_p7, %p382_p6 }
 0x307   : > { %p410_p12 = por %p409_p11, %p408_p10 }
 0x308   : > { %p404_p9 = pneg %p403_p8 }
 0x30a   : > { %p411_p13 = pnand %p410_p12, %p404_p9 }
 0x30c   : > { %414 = shalt.err (!%p411_p13)
}
 0x30d   : > { %s415_s6 = scalar_lea.hbm %s519_s3, 16 }
 0x30e   : > { %p416_p0 = scmp.ne.s32.totalorder %s519_s3, %s415_s6  ;;  %p421_p3 = scmp.lt.u32.totalorder %s415_s6, %s519_s3 }
 0x310   : > { %p417_p1 = pnand %p416_p0, %p382_p6 }
 0x312   : > { %p418_p2 = pneg %p417_p1 }
 0x314   : > { %p423_p4 = pnand %p421_p3, %p418_p2 }
 0x316   : > { %426 = shalt.err (!%p423_p4)
}
 0x317   : > { %379 = dma.vmem_to_hbm [thread:$0]  (%p382_p6), %s301_s28, 16, %s519_s3, [#allocation3]  }
 0x318   : > { %432 = dma.done.wait (%p382_p6), [#allocation3], 16  }
 0x319   : > { %434 = vsyncadd (%p382_p6), [#allocation3], 4294967280 }
 0x31a PF: > { %s14_s12 = sadd.s32 1, %s437_s12  }
 0x31b   : > { %p11_p5 = scmp.ge.s32.totalorder %s14_s12, 4  }
 0x31d   :  { %13 = sbr.rel (!%p11_p5) target bundleno = 1 (0x1), region = 70 }
 0x324   :  { %313 = vsyncpa [#allocation3], 1 }
 0x325   :  { %315 = vsyncpa [#allocation3 + $0x1], 1 }

// kernel: simo_forward.3
= control target key start
LH: loop header
LB: loop body
LE: loop exit
PB: predicated region body
PF: predicated region fallthrough
CT: control target
= control target key end

     0   :  { %s1622_s24 = smov 0   ;;  %s1624_s25 = smov 0   ;;  %s1847_s0 = inlined_call_operand.vmem [shape: f32[16,1024], index: 0, kind: input, shape index: {}]   ;;  %s1848_s1 = inlined_call_operand.vmem [shape: bf16[1024,256], index: 1, kind: input, shape index: {}]   ;;  %s1849_s2 = inlined_call_operand.vmem [shape: f32[1,256], index: 2, kind: input, shape index: {}]   ;;  %s1850_s3 = inlined_call_operand.vmem [shape: bf16[256,128], index: 3, kind: input, shape index: {}]   ;;  %s1851_s4 = inlined_call_operand.vmem [shape: f32[1,128], index: 4, kind: input, shape index: {}]   ;;  %s1852_s5 = inlined_call_operand.vmem [shape: bf16[128,128], index: 5, kind: input, shape index: {}]   ;;  %s1853_s6 = inlined_call_operand.vmem [shape: f32[1,128], index: 6, kind: input, shape index: {}]   ;;  %s1854_s7 = inlined_call_operand.vmem [shape: f32[16,128], index: 7, kind: output, shape index: {}]  }
   0x1   :  { %s1626_s26 = smov 0   ;;  %s1628_s27 = smov 0  }
   0x2   :  { %s1630_s28 = smov 0  }
   0x3 LB: > { %s26_s29 = sadd.s32 1, %s1569_s26  ;;  %s29_s30 = sadd.s32 1, %s1573_s27  ;;  %s1577_s28 = sphi %s1630_s28, %s17_s28   ;;  %s1573_s27 = sphi %s1628_s27, %s1858_s27   ;;  %s1569_s26 = sphi %s1626_s26, %s1857_s26   ;;  %s1565_s25 = sphi %s1624_s25, %s1856_s25   ;;  %s1561_s24 = sphi %s1622_s24, %s1855_s24  }
   0x4   : > { %p27_p0 = scmp.ge.s32.totalorder %s26_s29, 2  ;;  %p1220_p1 = scmp.ge.s32.totalorder %s1577_s28, 1 }
   0x5   : > { %p268_p2 = scmp.lt.s32.totalorder %s1577_s28, 5 }
   0x6   : > { %s1860_s29 = smov (%p27_p0, %s26_s29), 0  ;;  %s1862_s30 = smov (!%p27_p0, %s29_s30), %s1573_s27 }
   0x7   : > { %p269_p3 = pnand %p1220_p1, %p268_p2  ;;  %p31_p4 = scmp.ge.s32.totalorder %s1862_s30, 2 }
   0x8   : > { %s1221_s8 = sshll.u32 (!%p269_p3), %s1561_s24, 2  ;;  %p310_p5 = scmp.lt.s32.totalorder (!%p269_p3), %s1565_s25, 1 }
   0x9   : > { %s1864_s30 = smov (%p31_p4, %s1862_s30), 0  ;;  %272 = sbr.rel (%p269_p3) target bundleno = 919 (0x397), region = 48 }
   0xa   : > { %p312_p6 = scmp.lt.s32.totalorder (!%p269_p3), %s1221_s8, 7  ;;  %s1224_s9 = sshll.u32 (!%p269_p3), %s1561_s24, 6 }
   0xb   : > { %p320_p7 = scmp.lt.s32.totalorder (!%p269_p3), %s1224_s9, 127  ;;  %p1228_p8 = scmp.ne.s32.totalorder (!%p269_p3), %s1561_s24, 0 }
  0x10   : > { %s1866_s25 = smov (!%p310_p5, %s1565_s25), 1  ;;  %s1868_s8 = smov (!%p312_p6, %s1221_s8), 7 }
  0x11   : > { %s1222_s10 = sshll.u32 %s1866_s25, 3  ;;  %s1870_s9 = smov (!%p320_p7, %s1224_s9), 127  ;;  %v1579_v0 = vmov (!%p1228_p8), 0.0  }
  0x12   : > { %s315_s11 = sadd.s32 %s1222_s10, %s1868_s8  ;;  %s1659_s14 = scalar_lea.vmem %s1854_s7, %s1222_s10  ;;  %335 = vst [vmem:[#allocation2] sm:$0xff] (!%p1228_p8), %v1579_v0  ;;  %336 = vst [vmem:[#allocation2 + $0x8] sm:$0xff] (!%p1228_p8), %v1579_v0 }
  0x13   : > { %s1223_s15 = sshll.u32 %s315_s11, 3  ;;  %s1322_s19 = sshll.u32 %s1870_s9, 3 }
  0x14   : > { %s1664_s18 = scalar_lea.vmem %s1847_s0, %s1223_s15  ;;  %s1669_s22 = scalar_lea.vmem %s1848_s1, %s1322_s19 }
  0x15   : > { %334 = sbr.rel (%p1228_p8) target bundleno = 28 (0x1c), region = 52 }
  0x1c PF: > { %v1417_v1 = vld [vmem:[%s1669_s22 + $0x4] ss:$8 sps:$4 sm:$0xff]   ;;  %v1421_v3 = vld [vmem:[%s1669_s22] ss:$8 sps:$4 sm:$0xff]   ;;  %v1423_v5 = vld [vmem:[%s1669_s22 + $0x14] ss:$8 sps:$4 sm:$0xff]  }
  0x1d   : > { %v1419_v2 = vld [vmem:[%s1669_s22 + $0x104] ss:$8 sps:$4 sm:$0xff]   ;;  %731 = vmatprep.subr.bf16.mxu0 %v1417_v1  ;;  %v1422_v4 = vld [vmem:[%s1669_s22 + $0x100] ss:$8 sps:$4 sm:$0xff]   ;;  %v1425_v6 = vld [vmem:[%s1669_s22 + $0x114] ss:$8 sps:$4 sm:$0xff]  }
  0x1e   : > { %772 = vmatprep.subr.bf16.mxu1 %v1419_v2  ;;  %732 = vmatpush1.bf16.msra.mxu0 %v1421_v3  ;;  %v1427_v7 = vld [vmem:[%s1669_s22 + $0x10] ss:$8 sps:$4 sm:$0xff]   ;;  %v1429_v9 = vld [vmem:[%s1669_s22 + $0x24] ss:$8 sps:$4 sm:$0xff]   ;;  %v1433_v11 = vld [vmem:[%s1669_s22 + $0x20] ss:$8 sps:$4 sm:$0xff]  }
  0x1f   : > { %773 = vmatpush1.bf16.msra.mxu1 %v1422_v4  ;;  %733 = vmatprep.subr.bf16.mxu0 %v1423_v5  ;;  %v1428_v8 = vld [vmem:[%s1669_s22 + $0x110] ss:$8 sps:$4 sm:$0xff]   ;;  %v1431_v10 = vld [vmem:[%s1669_s22 + $0x124] ss:$8 sps:$4 sm:$0xff]   ;;  %v1434_v12 = vld [vmem:[%s1669_s22 + $0x120] ss:$8 sps:$4 sm:$0xff]  }
  0x20   : > { %774 = vmatprep.subr.bf16.mxu1 %v1425_v6  ;;  %v1435_v13 = vld [vmem:[%s1669_s22 + $0x34] ss:$8 sps:$4 sm:$0xff]   ;;  %v1439_v15 = vld [vmem:[%s1669_s22 + $0x30] ss:$8 sps:$4 sm:$0xff]   ;;  %v1441_v17 = vld [vmem:[%s1669_s22 + $0x44] ss:$8 sps:$4 sm:$0xff]  }
  0x21   : > { %v1437_v14 = vld [vmem:[%s1669_s22 + $0x134] ss:$8 sps:$4 sm:$0xff]   ;;  %v1440_v16 = vld [vmem:[%s1669_s22 + $0x130] ss:$8 sps:$4 sm:$0xff]   ;;  %v1443_v18 = vld [vmem:[%s1669_s22 + $0x144] ss:$8 sps:$4 sm:$0xff]  }
  0x22   : > { %734 = vmatpush1.bf16.msra.mxu0 %v1427_v7  ;;  %v1445_v19 = vld [vmem:[%s1669_s22 + $0x40] ss:$8 sps:$4 sm:$0xff]   ;;  %v1447_v21 = vld [vmem:[%s1669_s22 + $0x54] ss:$8 sps:$4 sm:$0xff]   ;;  %v1451_v23 = vld [vmem:[%s1669_s22 + $0x50] ss:$8 sps:$4 sm:$0xff]  }
  0x23   : > { %775 = vmatpush1.bf16.msra.mxu1 %v1428_v8  ;;  %735 = vmatprep.subr.bf16.mxu0 %v1429_v9  ;;  %v1446_v20 = vld [vmem:[%s1669_s22 + $0x140] ss:$8 sps:$4 sm:$0xff]   ;;  %v1449_v22 = vld [vmem:[%s1669_s22 + $0x154] ss:$8 sps:$4 sm:$0xff]   ;;  %v1452_v24 = vld [vmem:[%s1669_s22 + $0x150] ss:$8 sps:$4 sm:$0xff]  }
  0x24   : > { %776 = vmatprep.subr.bf16.mxu1 %v1431_v10  ;;  %v1453_v25 = vld [vmem:[%s1669_s22 + $0x64] ss:$8 sps:$4 sm:$0xff]   ;;  %v1457_v27 = vld [vmem:[%s1669_s22 + $0x60] ss:$8 sps:$4 sm:$0xff]   ;;  %v1459_v29 = vld [vmem:[%s1669_s22 + $0x74] ss:$8 sps:$4 sm:$0xff]  }
  0x25   : > { %v1455_v26 = vld [vmem:[%s1669_s22 + $0x164] ss:$8 sps:$4 sm:$0xff]   ;;  %v1458_v28 = vld [vmem:[%s1669_s22 + $0x160] ss:$8 sps:$4 sm:$0xff]   ;;  %v1461_v30 = vld [vmem:[%s1669_s22 + $0x174] ss:$8 sps:$4 sm:$0xff]  }
  0x26   : > { %736 = vmatpush1.bf16.msra.mxu0 %v1433_v11  ;;  %v1463_v31 = vld [vmem:[%s1669_s22 + $0x70] ss:$8 sps:$4 sm:$0xff]   ;;  %v1465_v33 = vld [vmem:[%s1669_s22 + $0x84] ss:$8 sps:$4 sm:$0xff]   ;;  %v1469_v35 = vld [vmem:[%s1669_s22 + $0x80] ss:$8 sps:$4 sm:$0xff]  }
  0x27   : > { %777 = vmatpush1.bf16.msra.mxu1 %v1434_v12  ;;  %737 = vmatprep.subr.bf16.mxu0 %v1435_v13  ;;  %v1464_v32 = vld [vmem:[%s1669_s22 + $0x170] ss:$8 sps:$4 sm:$0xff]   ;;  %v1467_v34 = vld [vmem:[%s1669_s22 + $0x184] ss:$8 sps:$4 sm:$0xff]   ;;  %v1470_v36 = vld [vmem:[%s1669_s22 + $0x180] ss:$8 sps:$4 sm:$0xff]  }
  0x28   : > { %778 = vmatprep.subr.bf16.mxu1 %v1437_v14  ;;  %v1471_v37 = vld [vmem:[%s1669_s22 + $0x94] ss:$8 sps:$4 sm:$0xff]   ;;  %v1475_v39 = vld [vmem:[%s1669_s22 + $0x90] ss:$8 sps:$4 sm:$0xff]   ;;  %v1477_v41 = vld [vmem:[%s1669_s22 + $0xa4] ss:$8 sps:$4 sm:$0xff]  }
  0x29   : > { %v1473_v38 = vld [vmem:[%s1669_s22 + $0x194] ss:$8 sps:$4 sm:$0xff]   ;;  %v1476_v40 = vld [vmem:[%s1669_s22 + $0x190] ss:$8 sps:$4 sm:$0xff]   ;;  %v1479_v42 = vld [vmem:[%s1669_s22 + $0x1a4] ss:$8 sps:$4 sm:$0xff]  }
  0x2a   : > { %738 = vmatpush1.bf16.msra.mxu0 %v1439_v15  ;;  %v1481_v43 = vld [vmem:[%s1669_s22 + $0xa0] ss:$8 sps:$4 sm:$0xff]   ;;  %v1483_v45 = vld [vmem:[%s1669_s22 + $0xb4] ss:$8 sps:$4 sm:$0xff]   ;;  %v1487_v50 = vld [vmem:[%s1669_s22 + $0xb0] ss:$8 sps:$4 sm:$0xff]  }
  0x2b   : > { %779 = vmatpush1.bf16.msra.mxu1 %v1440_v16  ;;  %739 = vmatprep.subr.bf16.mxu0 %v1441_v17  ;;  %v1482_v44 = vld [vmem:[%s1669_s22 + $0x1a0] ss:$8 sps:$4 sm:$0xff]   ;;  %v1485_v46 = vld [vmem:[%s1669_s22 + $0x1b4] ss:$8 sps:$4 sm:$0xff]   ;;  %v1488_v51 = vld [vmem:[%s1669_s22 + $0x1b0] ss:$8 sps:$4 sm:$0xff]  }
  0x2c   : > { %780 = vmatprep.subr.bf16.mxu1 %v1443_v18  ;;  %v340_v47 = vld [vmem:[%s1664_s18 + $0x8] sm:$0xff]  ;;  %v342_v49 = vld [vmem:[%s1664_s18 + $0x18] sm:$0xff]  ;;  %v339_v5 = vld [vmem:[%s1664_s18] sm:$0xff]  ;;  %p1293_p9 = scmp.ne.s32.totalorder %s1561_s24, 1 }
  0x2d   : > { %v344_v48 = vpack.c.bf16 %v340_v47, %v340_v47  ;;  %v346_v52 = vpack.c.bf16 %v342_v49, %v342_v49  ;;  %v1489_v53 = vld [vmem:[%s1669_s22 + $0xc4] ss:$8 sps:$4 sm:$0xff]   ;;  %v1493_v55 = vld [vmem:[%s1669_s22 + $0xc0] ss:$8 sps:$4 sm:$0xff]   ;;  %v1495_v57 = vld [vmem:[%s1669_s22 + $0xd4] ss:$8 sps:$4 sm:$0xff]   ;;  %v343_v7 = vpack.c.bf16 %v339_v5, %v339_v5 }
  0x2e   : > { %740 = vmatpush1.bf16.msra.mxu0 %v1445_v19  ;;  %v1491_v54 = vld [vmem:[%s1669_s22 + $0x1c4] ss:$8 sps:$4 sm:$0xff]   ;;  %v1494_v56 = vld [vmem:[%s1669_s22 + $0x1c0] ss:$8 sps:$4 sm:$0xff]   ;;  %v1497_v58 = vld [vmem:[%s1669_s22 + $0x1d4] ss:$8 sps:$4 sm:$0xff]  }
  0x2f   : > { %781 = vmatpush1.bf16.msra.mxu1 %v1446_v20  ;;  %741 = vmatprep.subr.bf16.mxu0 %v1447_v21  ;;  %v1499_v59 = vld [vmem:[%s1669_s22 + $0xd0] ss:$8 sps:$4 sm:$0xff]   ;;  %v1501_v61 = vld [vmem:[%s1669_s22 + $0xe4] ss:$8 sps:$4 sm:$0xff]   ;;  %v1505_v63 = vld [vmem:[%s1669_s22 + $0xe0] ss:$8 sps:$4 sm:$0xff]  }
  0x30   : > { %782 = vmatprep.subr.bf16.mxu1 %v1449_v22  ;;  %763 = vmatprep.mubr.bf16.mxu0 %v344_v48  ;;  %v1500_v60 = vld [vmem:[%s1669_s22 + $0x1d0] ss:$8 sps:$4 sm:$0xff]   ;;  %v1503_v62 = vld [vmem:[%s1669_s22 + $0x1e4] ss:$8 sps:$4 sm:$0xff]   ;;  %v1506_v0 = vld [vmem:[%s1669_s22 + $0x1e0] ss:$8 sps:$4 sm:$0xff]  }
  0x31   : > { %804 = vmatprep.mubr.bf16.mxu1 %v346_v52  ;;  %v1507_v1 = vld [vmem:[%s1669_s22 + $0xf4] ss:$8 sps:$4 sm:$0xff]   ;;  %v1511_v3 = vld [vmem:[%s1669_s22 + $0xf0] ss:$8 sps:$4 sm:$0xff]   ;;  %v337_v10 = vld [vmem:[#allocation2] sm:$0xff]  ;;  %vm1581_vm0 = vmmov (!%p1293_p9), 0  }
  0x32   : > { %742 = vmatpush1.bf16.msra.mxu0 %v1451_v23  ;;  %v1509_v2 = vld [vmem:[%s1669_s22 + $0x1f4] ss:$8 sps:$4 sm:$0xff]   ;;  %v1512_v4 = vld [vmem:[%s1669_s22 + $0x1f0] ss:$8 sps:$4 sm:$0xff]   ;;  %v338_v14 = vld [vmem:[#allocation2 + $0x8] sm:$0xff] }
  0x33   : > { %783 = vmatpush1.bf16.msra.mxu1 %v1452_v24  ;;  %743 = vmatprep.subr.bf16.mxu0 %v1453_v25  ;;  %v341_v6 = vld [vmem:[%s1664_s18 + $0x10] sm:$0xff]  ;;  %v1513_v23 = vld [vmem:[%s1850_s3 + $0x40] sm:$0xff] (!%p1293_p9)   ;;  %v1580_v25 = vmov (!%p1293_p9), 0.0  }
  0x34   : > { %784 = vmatprep.subr.bf16.mxu1 %v1455_v26  ;;  %v345_v8 = vpack.c.bf16 %v341_v6, %v341_v6  ;;  %v1514_v24 = vld [vmem:[%s1850_s3] sm:$0xff] (!%p1293_p9)   ;;  %v1515_v26 = vld [vmem:[%s1850_s3 + $0x48] sm:$0xff] (!%p1293_p9)   ;;  %v1526_v47 = vld [vmem:[%s1850_s3 + $0x30] sm:$0xff] (!%p1293_p9)  }
  0x35   : > { %v1531_v52 = vld [vmem:[%s1852_s5 + $0x10] sm:$0xff] (!%p1293_p9)   ;;  %v1311_v6 = vld [vmem:[%s1853_s6] ss:$0 sm:$0xff] (!%p1293_p9) }
  0x36   : > { %744 = vmatpush1.bf16.msra.mxu0 %v1457_v27  ;;  %v1516_v27 = vld [vmem:[%s1850_s3 + $0x8] sm:$0xff] (!%p1293_p9)  }
  0x37   : > { %785 = vmatpush1.bf16.msra.mxu1 %v1458_v28  ;;  %745 = vmatprep.subr.bf16.mxu0 %v1459_v29  ;;  %v1517_v28 = vld [vmem:[%s1850_s3 + $0x50] sm:$0xff] (!%p1293_p9)   ;;  %v825_v29 = vlaneseq (!%p1293_p9) }
  0x38   : > { %786 = vmatprep.subr.bf16.mxu1 %v1461_v30  ;;  %v1518_v30 = vld [vmem:[%s1850_s3 + $0x10] sm:$0xff] (!%p1293_p9)  }
  0x3a   : > { %746 = vmatpush1.bf16.msra.mxu0 %v1463_v31  ;;  %v1519_v31 = vld [vmem:[%s1850_s3 + $0x58] sm:$0xff] (!%p1293_p9)  }
  0x3b   : > { %787 = vmatpush1.bf16.msra.mxu1 %v1464_v32  ;;  %747 = vmatprep.subr.bf16.mxu0 %v1465_v33  ;;  %v826_v32 = vshrl.u32 (!%p1293_p9), %v825_v29, 7  ;;  %v1520_v33 = vld [vmem:[%s1850_s3 + $0x18] sm:$0xff] (!%p1293_p9)  }
  0x3c   : > { %788 = vmatprep.subr.bf16.mxu1 %v1467_v34  ;;  %v1521_v34 = vld [vmem:[%s1850_s3 + $0x60] sm:$0xff] (!%p1293_p9)  }
  0x3e   : > { %748 = vmatpush1.bf16.msra.mxu0 %v1469_v35  ;;  %v831_v35 = vsub.s32 (!%p1293_p9), 1, %v826_v32 }
  0x3f   : > { %789 = vmatpush1.bf16.msra.mxu1 %v1470_v36  ;;  %749 = vmatprep.subr.bf16.mxu0 %v1471_v37  ;;  %v1522_v36 = vld [vmem:[%s1850_s3 + $0x20] sm:$0xff] (!%p1293_p9)   ;;  %v1523_v37 = vld [vmem:[%s1850_s3 + $0x68] sm:$0xff] (!%p1293_p9)  }
  0x40   : > { %790 = vmatprep.subr.bf16.mxu1 %v1473_v38 }
  0x42   : > { %750 = vmatpush1.bf16.msra.mxu0 %v1475_v39  ;;  %v823_v39 = vld [vmem:[%s1849_s2] sm:$0x3] (!%p1293_p9) }
  0x43   : > { %791 = vmatpush1.bf16.msra.mxu1 %v1476_v40  ;;  %751 = vmatprep.subr.bf16.mxu0 %v1477_v41  ;;  %v832_v40 = vrot.slane (!%p1293_p9), %v823_v39, %v831_v35  ;;  %v1529_v41 = vld [vmem:[%s1852_s5] sm:$0xff] (!%p1293_p9)  }
  0x44   : > { %792 = vmatprep.subr.bf16.mxu1 %v1479_v42  ;;  %v1524_v42 = vld [vmem:[%s1850_s3 + $0x28] sm:$0xff] (!%p1293_p9)  }
  0x46   : > { %752 = vmatpush1.bf16.msra.mxu0 %v1481_v43  ;;  %v827_v43 = vsub.s32 (!%p1293_p9), 0, %v826_v32 }
  0x47   : > { %793 = vmatpush1.bf16.msra.mxu1 %v1482_v44  ;;  %753 = vmatprep.subr.bf16.mxu0 %v1483_v45  ;;  %v1525_v44 = vld [vmem:[%s1850_s3 + $0x70] sm:$0xff] (!%p1293_p9)  }
  0x48   : > { %794 = vmatprep.subr.bf16.mxu1 %v1485_v46  ;;  %v1530_v46 = vld [vmem:[%s1852_s5 + $0x8] sm:$0xff] (!%p1293_p9)   ;;  %v828_v49 = vrot.slane (!%p1293_p9), %v823_v39, %v827_v43 }
  0x4a   : > { %754 = vmatpush1.bf16.msra.mxu0 %v1487_v50 }
  0x4b   : > { %795 = vmatpush1.bf16.msra.mxu1 %v1488_v51  ;;  %755 = vmatprep.subr.bf16.mxu0 %v1489_v53  ;;  %v1527_v51 = vld [vmem:[%s1850_s3 + $0x78] sm:$0xff] (!%p1293_p9)  }
  0x4c   : > { %796 = vmatprep.subr.bf16.mxu1 %v1491_v54  ;;  %v1528_v54 = vld [vmem:[%s1850_s3 + $0x38] sm:$0xff] (!%p1293_p9)  }
  0x4e   : > { %756 = vmatpush1.bf16.msra.mxu0 %v1493_v55  ;;  %v1532_v55 = vld [vmem:[%s1852_s5 + $0x18] sm:$0xff] (!%p1293_p9)  }
  0x4f   : > { %797 = vmatpush1.bf16.msra.mxu1 %v1494_v56  ;;  %757 = vmatprep.subr.bf16.mxu0 %v1495_v57  ;;  %v1533_v57 = vld [vmem:[%s1852_s5 + $0x20] sm:$0xff] (!%p1293_p9)  }
  0x50   : > { %798 = vmatprep.subr.bf16.mxu1 %v1497_v58  ;;  %v1534_v58 = vld [vmem:[%s1852_s5 + $0x28] sm:$0xff] (!%p1293_p9)  }
  0x52   : > { %758 = vmatpush1.bf16.msra.mxu0 %v1499_v59  ;;  %v1535_v59 = vld [vmem:[%s1852_s5 + $0x30] sm:$0xff] (!%p1293_p9)  }
  0x53   : > { %799 = vmatpush1.bf16.msra.mxu1 %v1500_v60  ;;  %759 = vmatprep.subr.bf16.mxu0 %v1501_v61  ;;  %v1536_v60 = vld [vmem:[%s1852_s5 + $0x38] sm:$0xff] (!%p1293_p9)  }
  0x54   : > { %800 = vmatprep.subr.bf16.mxu1 %v1503_v62  ;;  %v1294_v62 = vld [vmem:[%s1851_s4] ss:$0 sm:$0xff] (!%p1293_p9) }
  0x56   : > { %760 = vmatpush1.bf16.msra.mxu0 %v1505_v63 }
  0x57   : > { %801 = vmatpush1.bf16.msra.mxu1 %v1506_v0  ;;  %761 = vmatprep.subr.bf16.mxu0 %v1507_v1 }
  0x58   : > { %802 = vmatprep.subr.bf16.mxu1 %v1509_v2 }
  0x5a   : > { %762 = vmatpush1.bf16.msra.mxu0 %v1511_v3 }
  0x5b   : > { %803 = vmatpush1.bf16.msra.mxu1 %v1512_v4  ;;  %1323 = vmatprep.subr.bf16.mxu0 (!%p1293_p9), %v1513_v23 }
  0x5c   : > { %1354 = vmatprep.subr.bf16.mxu1 (!%p1293_p9), %v1580_v25 }
  0x5d   : > { %764 = vmatmul.mubr.bf16.vlgmr.msra.gmra.mrb[0].mxu0 %v343_v7 }
  0x5e   : > { %805 = vmatmul.mubr.bf16.vlgmr.msra.gmra.mrb[0].mxu1 %v345_v8  ;;  %1324 = vmatpush3.bf16.msra.mxu0 (!%p1293_p9), %v1514_v24 }
  0x5f   : > { %1325 = vmatprep.subr.bf16.mxu0 (!%p1293_p9), %v1515_v26  ;;  %1355 = vmatpush3.bf16.msra.mxu1 (!%p1293_p9), %v1529_v41 }
  0x60   : > { %1356 = vmatprep.subr.bf16.mxu1 (!%p1293_p9), %v1580_v25  ;;  %1370 = vmatprep.mubr.msk.bf16.mxu1 (!%p1293_p9), %vm1581_vm0, %v1580_v25 }
  0x62   : > { %1326 = vmatpush3.bf16.msra.mxu0 (!%p1293_p9), %v1516_v27 }
  0x63   : > { %1327 = vmatprep.subr.bf16.mxu0 (!%p1293_p9), %v1517_v28  ;;  %1357 = vmatpush3.bf16.msra.mxu1 (!%p1293_p9), %v1530_v46 }
  0x64   : > { %1358 = vmatprep.subr.bf16.mxu1 (!%p1293_p9), %v1580_v25 }
  0x66   : > { %1328 = vmatpush3.bf16.msra.mxu0 (!%p1293_p9), %v1518_v30 }
  0x67   : > { %1329 = vmatprep.subr.bf16.mxu0 (!%p1293_p9), %v1519_v31  ;;  %1359 = vmatpush3.bf16.msra.mxu1 (!%p1293_p9), %v1531_v52 }
  0x68   : > { %1360 = vmatprep.subr.bf16.mxu1 (!%p1293_p9), %v1580_v25 }
  0x6a   : > { %1330 = vmatpush3.bf16.msra.mxu0 (!%p1293_p9), %v1520_v33 }
  0x6b   : > { %1331 = vmatprep.subr.bf16.mxu0 (!%p1293_p9), %v1521_v34  ;;  %1361 = vmatpush3.bf16.msra.mxu1 (!%p1293_p9), %v1532_v55 }
  0x6c   : > { %1362 = vmatprep.subr.bf16.mxu1 (!%p1293_p9), %v1580_v25 }
  0x6e   : > { %1332 = vmatpush3.bf16.msra.mxu0 (!%p1293_p9), %v1522_v36 }
  0x6f   : > { %1333 = vmatprep.subr.bf16.mxu0 (!%p1293_p9), %v1523_v37  ;;  %1363 = vmatpush3.bf16.msra.mxu1 (!%p1293_p9), %v1533_v57 }
  0x70   : > { %1364 = vmatprep.subr.bf16.mxu1 (!%p1293_p9), %v1580_v25 }
  0x72   : > { %1334 = vmatpush3.bf16.msra.mxu0 (!%p1293_p9), %v1524_v42 }
  0x73   : > { %1335 = vmatprep.subr.bf16.mxu0 (!%p1293_p9), %v1525_v44  ;;  %1365 = vmatpush3.bf16.msra.mxu1 (!%p1293_p9), %v1534_v58 }
  0x74   : > { %1366 = vmatprep.subr.bf16.mxu1 (!%p1293_p9), %v1580_v25 }
  0x76   : > { %1336 = vmatpush3.bf16.msra.mxu0 (!%p1293_p9), %v1526_v47 }
  0x77   : > { %1337 = vmatprep.subr.bf16.mxu0 (!%p1293_p9), %v1527_v51  ;;  %1367 = vmatpush3.bf16.msra.mxu1 (!%p1293_p9), %v1535_v59 }
  0x78   : > { %1368 = vmatprep.subr.bf16.mxu1 (!%p1293_p9), %v1580_v25 }
  0x7a   : > { %1338 = vmatpush3.bf16.msra.mxu0 (!%p1293_p9), %v1528_v54 }
  0x7b   : > { %1369 = vmatpush3.bf16.msra.mxu1 (!%p1293_p9), %v1536_v60 }
 0x130   : > { %v765_v9 = vpop.f32.mrb[0].mxu0 }
 0x131   : > { %v806_v11 = vpop.f32.mrb[0].mxu1  ;;  %v767_v13 = vpop.f32.mrb[1].mxu0  ;;  %820 = sbr.rel (%p1293_p9) target bundleno = 919 (0x397), region = 56 }
 0x132   : > { %v807_v12 = vadd.f32 %v806_v11, %v765_v9  ;;  %v808_v15 = vpop.f32.mrb[1].mxu1  ;;  %v769_v17 = vpop.f32.mrb[2].mxu0 }
 0x133   : > { %v809_v16 = vadd.f32 %v808_v15, %v767_v13  ;;  %v810_v18 = vpop.f32.mrb[2].mxu1  ;;  %v770_v20 = vpop.f32.mrb[3].mxu0 }
 0x134   : > { %v813_v19 = vadd.f32 %v807_v12, %v337_v10  ;;  %v811_v21 = vpop.f32.mrb[3].mxu1 }
 0x135   : > { %v814_v22 = vadd.f32 %v809_v16, %v338_v14 }
 0x136   : > { %815 = vst [vmem:[#allocation2] sm:$0xff] %v813_v19 }
 0x137   : > { %816 = vst [vmem:[#allocation2 + $0x8] sm:$0xff] %v814_v22 }
 0x13d   : > { %v821_v50 = vld [vmem:[#allocation2] sm:$0xff] }
 0x13e   : > { %v822_v38 = vld [vmem:[#allocation2 + $0x8] sm:$0xff]  ;;  %v835_v53 = vadd.f32 %v828_v49, %v821_v50 }
 0x13f   : > { %v836_v45 = vadd.f32 %v832_v40, %v822_v38 }
 0x140   : > { %v837_v56 = vpack.c.bf16 %v835_v53, %v835_v53 }
 0x141   : > { %v838_v48 = vpack.c.bf16 %v836_v45, %v836_v45 }
 0x143   : > { %1006 = vmatprep.mubr.bf16.mxu0 %v838_v48 }
 0x144   : > { %1007 = vmatmul.mubr.bf16.vlgmr.msra.gmra.mrb[0].mxu0 %v837_v56 }
 0x217   : > { %v1339_v61 = vpop.f32.mrb[0].mxu0 }
 0x218   : > { %v1340_v63 = vpop.f32.mrb[1].mxu0 }
 0x219   : > { %v1341_v0 = vadd.f32 %v1340_v63, %v1339_v61  ;;  %v1342_v1 = vpop.f32.mrb[2].mxu0 }
 0x21a   : > { %v1343_v2 = vpop.f32.mrb[3].mxu0 }
 0x21b   : > { %v1009_v3 = vadd.f32 %v1341_v0, %v1294_v62 }
 0x21d   : > { %v1014_v4 = vmax.f32 %v1009_v3, 0.0 }
 0x21f   : > { %v1015_v5 = vpack.c.bf16 %v1014_v4, %v1014_v4 }
 0x221   : > { %1371 = vmatmul.mubr.bf16.vlgmr.msra.gmra.mrb[0].mxu1 %v1015_v5 }
 0x2f4   : > { %v1121_v7 = vpop.f32.mrb[0].mxu1 }
 0x2f5   : > { %v1122_v8 = vadd.f32 %v1311_v6, %v1121_v7  ;;  %v1372_v9 = vpop.f32.mrb[1].mxu1 }
 0x2f6   : > { %v1124_v10 = vpop.f32.mrb[2].mxu1 }
 0x2f7   : > { %v1373_v11 = vpop.f32.mrb[3].mxu1  ;;  %v1127_v12 = vmul.f32 %v1122_v8, %v1122_v8 }
 0x2f9   : > { %1128 = vadd.xlane.f32.xlu0 %v1127_v12 }
 0x386   : > { %v1129_v13 = vpop.xlane.xlu0 %1128 }
 0x387   : > { %v1130_v14 = vmax.f32 %v1129_v13, 1e-24 }
 0x389   : > { %1537 = vrsqrt.f32 %v1130_v14 }
 0x393   : > { %v1538_v15 = vpop.eup %1537 }
 0x394   : > { %v1132_v16 = vmul.f32 %v1538_v15, %v1122_v8 }
 0x396   : > { %1133 = vst [vmem:[%s1659_s14] sm:$0xff] %v1132_v16 }
 0x397 PF: > { %s17_s28 = sadd.s32 1, %s1577_s28   ;;  %s1855_s24 = smov %s1569_s26 }
 0x398   : > { %p14_p10 = scmp.ge.s32.totalorder %s17_s28, 6   ;;  %s1856_s25 = smov %s1573_s27 }
 0x399   : > { %s1857_s26 = smov %s1860_s29  ;;  %s1858_s27 = smov %s1864_s30 }
 0x39a   :  { %16 = sbr.rel (!%p14_p10) target bundleno = 3 (0x3), region = 89 }

</bundles_post_ra>
